<compile_context>
chip_gen: v6e
topology: v6e:2x2x1
jax: 0.10.0
libtpu: 0.0.40
codegen_flags: <defaults>
</compile_context>

<pallas_src>
from functools import partial

import numpy as np
import jax
import jax.numpy as jnp
from jax import lax
from jax.experimental import pallas as pl
from jax.experimental.pallas import tpu as pltpu


def _round_up(x, m):
    return ((x + m - 1) // m) * m


def _cdiv(a, b):
    return -(-a // b)


def _tpu_caps():
    """Device-aware tile caps: VMEM budget, bf16-EUP availability, #TensorCores."""
    kind = ""
    try:
        kind = jax.devices()[0].device_kind.lower()
    except Exception:
        pass
    if "v5" in kind:
        # 16 MiB scoped-VMEM default, no bf16 VPU/EUP, 1 TensorCore.
        return dict(max_bb=16384, act_dtype=jnp.float32, vmem_limit=None, min_grid=1)
    if "v6" in kind:
        # 128 MiB physical VMEM, bf16 EUP, 1 TensorCore -> push the tile, raise limit.
        return dict(max_bb=32768, act_dtype=jnp.bfloat16,
                    vmem_limit=64 * 1024 * 1024, min_grid=1)
    if "v7" in kind or "7x" in kind:
        # 64 MiB physical / 32 MiB scoped VMEM, bf16 EUP, 2 TensorCores -> grid >= 2.
        return dict(max_bb=32768, act_dtype=jnp.bfloat16, vmem_limit=None, min_grid=2)
    # Unknown hardware: conservative settings.
    return dict(max_bb=16384, act_dtype=jnp.float32, vmem_limit=None, min_grid=2)


def _znet_kernel(xT_ref, w1_ref, b1_ref, w2_ref, b2_ref, w3_ref, b3_ref, o_ref,
                 *, n_sub, act_dtype, mm_dtype, precision):
    # Weights/biases are tiny and VMEM-resident: load once, hoisted out of the
    # sub-chunk loop (weights are already pre-cast to mm_dtype by the wrapper).
    w1, b1 = w1_ref[...], b1_ref[...]
    w2, b2 = w2_ref[...], b2_ref[...]
    w3, b3 = w3_ref[...], b3_ref[...]

    bb = xT_ref.shape[-1]
    sc = bb // n_sub          # sub-chunk width (multiple of 128 by construction)

    # Statically unrolled sub-chunk loop: lets the scheduler overlap chunk
    # j+1's matmuls (MXU) with chunk j's tanh (EUP) / bias+cast (VPU) work.
    for j in range(n_sub):
        cols = pl.ds(j * sc, sc)                 # 128-lane-aligned static slice
        xT = xT_ref[:, cols]                     # (D1, sc), mm_dtype

        # Layer 1: (H, D1) @ (D1, sc) + (H, 1)   [f32 accumulate on the MXU]
        z1 = jnp.dot(w1, xT, preferred_element_type=jnp.float32,
                     precision=precision) + b1
        h1 = jnp.tanh(z1.astype(act_dtype)).astype(mm_dtype)

        # Layer 2: (H, H) @ (H, sc) + (H, 1)
        z2 = jnp.dot(w2, h1, preferred_element_type=jnp.float32,
                     precision=precision) + b2
        h2 = jnp.tanh(z2.astype(act_dtype)).astype(mm_dtype)

        # Layer 3: (dim, H) @ (H, sc) + (dim, 1) -> lane-dense store.
        # TODO(synk): layers 1 (K=4) and 3 (M=3) could move off the MXU onto
        # VPU broadcast-FMAs if the MXU-push slot is confirmed as binding.
        out = jnp.dot(w3, h2, preferred_element_type=jnp.float32,
                      precision=precision) + b3
        o_ref[:, cols] = out.astype(o_ref.dtype)


def znet_forward(x, params, *, block_b=None, mm_dtype=jnp.bfloat16,
                 x_transposed=False, return_transposed=False):
    """Znet forward pass as a Pallas TPU kernel.

    x:      (B, dim+1) float32   (or (dim+1, B) if x_transposed=True)
    params: PyTorch-layout weights: w1 (H, dim+1), b1 (H, 1), w2 (H, H),
            b2 (H, 1), w3 (dim, H), b3 (dim, 1)
    returns (B, dim) float32     (or (dim, B) if return_transposed=True)
    """
    if x_transposed:
        D1, B = x.shape
    else:
        B, D1 = x.shape
    H = params["w1"].shape[0]
    dim = params["w3"].shape[0]

    mm_dtype = np.dtype(mm_dtype)
    mm_is_f32 = (mm_dtype == np.dtype(np.float32))
    caps = _tpu_caps()
    act_dtype = jnp.float32 if mm_is_f32 else caps["act_dtype"]
    precision = lax.Precision.HIGHEST if mm_is_f32 else lax.Precision.DEFAULT

    max_bb = int(block_b) if block_b is not None else caps["max_bb"]
    if mm_is_f32:
        max_bb = max(128, max_bb // 2)   # f32 intermediates are 2x wider

    # Lane-tile selection: as large as the VMEM budget allows (amortizes the
    # ~0.35 us/step grid overhead) but at least `min_grid` blocks, so on v7x
    # both TensorCores get work via the "parallel" grid axis.
    n_blocks = max(caps["min_grid"], _cdiv(B, max_bb))
    target = _cdiv(B, n_blocks)
    quantum = 512 if target >= 512 else 128
    bb = max(128, min(max_bb, _round_up(target, quantum)))
    grid = (_cdiv(B, bb),)

    # In-kernel sub-chunking (statically unrolled) for MXU/EUP/VPU overlap.
    if bb >= 2048 and bb % 512 == 0:
        n_sub = 4
    elif bb >= 1024 and bb % 256 == 0:
        n_sub = 2
    else:
        n_sub = 1

    # Batch-in-lanes layout.  This transpose (and the matching one on the
    # output) is the only wrapper-side data movement; pass x_transposed /
    # return_transposed to keep the (features, batch) layout end-to-end and
    # skip both.  No jnp.pad: ragged tails use the masked partial final block.
    xT = x if x_transposed else x.T
    xT = xT.astype(mm_dtype)

    # Pre-cast weights once (VMEM-resident, constant index_map); biases stay
    # f32 and are added to the f32 MXU accumulator.
    w1 = jnp.asarray(params["w1"], mm_dtype)
    w2 = jnp.asarray(params["w2"], mm_dtype)
    w3 = jnp.asarray(params["w3"], mm_dtype)
    b1 = jnp.asarray(params["b1"], jnp.float32)
    b2 = jnp.asarray(params["b2"], jnp.float32)
    b3 = jnp.asarray(params["b3"], jnp.float32)

    full = lambda shape: pl.BlockSpec(shape, lambda i: (0, 0))

    out_t = pl.pallas_call(
        partial(_znet_kernel, n_sub=n_sub, act_dtype=act_dtype,
                mm_dtype=mm_dtype, precision=precision),
        out_shape=jax.ShapeDtypeStruct((dim, B), jnp.float32),
        grid_spec=pltpu.PrefetchScalarGridSpec(
            num_scalar_prefetch=0,
            grid=grid,
            in_specs=[
                pl.BlockSpec((D1, bb), lambda i: (0, i)),   # xT tile (lane-dense)
                full((H, D1)),                              # w1 (resident)
                full((H, 1)),                               # b1
                full((H, H)),                               # w2
                full((H, 1)),                               # b2
                full((dim, H)),                             # w3
                full((dim, 1)),                             # b3
            ],
            out_specs=pl.BlockSpec((dim, bb), lambda i: (0, i)),  # lane-dense out
        ),
        compiler_params=pltpu.CompilerParams(
            dimension_semantics=("parallel",),
            vmem_limit_bytes=caps["vmem_limit"],
        ),
    )(xT, w1, b1, w2, b2, w3, b3)

    return out_t if return_transposed else out_t.T


def init_params(key, dim, num_neurons):
    """PyTorch-style uniform(-1/sqrt(fan_in), 1/sqrt(fan_in)) init.

    Weights use PyTorch's (out_features, in_features) layout; biases are
    stored as (out_features, 1) so they broadcast over the lane (batch) dim.
    """
    d1 = dim + 1
    ks = jax.random.split(key, 6)

    def uinit(k, shape, fan_in):
        bound = 1.0 / jnp.sqrt(fan_in)
        return jax.random.uniform(k, shape, jnp.float32, -bound, bound)

    return {
        "w1": uinit(ks[0], (num_neurons, d1), d1),
        "b1": uinit(ks[1], (num_neurons, 1), d1),
        "w2": uinit(ks[2], (num_neurons, num_neurons), num_neurons),
        "b2": uinit(ks[3], (num_neurons, 1), num_neurons),
        "w3": uinit(ks[4], (dim, num_neurons), num_neurons),
        "b3": uinit(ks[5], (dim, 1), num_neurons),
    }


def znet_reference(x, params):
    """float64 NumPy reference matching the PyTorch module (device-independent)."""
    xn = np.asarray(x, np.float64)
    w1 = np.asarray(params["w1"], np.float64); b1 = np.asarray(params["b1"], np.float64)[:, 0]
    w2 = np.asarray(params["w2"], np.float64); b2 = np.asarray(params["b2"], np.float64)[:, 0]
    w3 = np.asarray(params["w3"], np.float64); b3 = np.asarray(params["b3"], np.float64)[:, 0]
    h1 = np.tanh(xn @ w1.T + b1)
    h2 = np.tanh(h1 @ w2.T + b2)
    return h2 @ w3.T + b3


if __name__ == "__main__":
    # pde['dim'] = 3 -> input features = dim + 1 = 4 ; sim['num_neurons'] = 32
    dim = 3
    num_neurons = 32

    key = jax.random.PRNGKey(0)
    kx, kx2, kp = jax.random.split(key, 3)
    params = init_params(kp, dim, num_neurons)

    # Case 1: small ragged batch (not a multiple of 128) -> exercises the
    # masked partial final block (no wrapper padding).
    x_small = jax.random.normal(kx, (200, dim + 1), jnp.float32)
    # Case 2: larger batch -> exercises the in-kernel sub-chunk loop and
    # (on v7x) the grid >= 2 / two-TensorCore path.
    x_large = jax.random.normal(kx2, (3000, dim + 1), jnp.float32)

    for x in (x_small, x_large):
        ref = znet_reference(x, params)

        # Default (fast) path: bf16 MXU inputs, bf16 tanh on v6e/v7x.
        out_bf16 = jax.block_until_ready(znet_forward(x, params))
        assert out_bf16.shape == (x.shape[0], dim), out_bf16.shape
        err = float(np.max(np.abs(np.asarray(out_bf16, np.float64) - ref)))
        # bf16 end-to-end gives ~1e-2-scale absolute error for O(1) activations.
        assert err < 1e-1, f"bf16 path mismatch vs reference: max abs err = {err}"

        # f32-faithful path (Precision.HIGHEST matmuls) for consumers that
        # need tighter numerics (e.g. PDE-residual gradients).  Tolerance is
        # conservative in case the backend still runs reduced-precision passes.
        out_f32 = jax.block_until_ready(znet_forward(x, params, mm_dtype=jnp.float32))
        err32 = float(np.max(np.abs(np.asarray(out_f32, np.float64) - ref)))
        assert err32 < 5e-2, f"f32 path mismatch vs reference: max abs err = {err32}"
        assert err32 <= err + 1e-6 or err32 < 1e-3, \
            f"f32 path should not be less accurate than bf16 path ({err32} vs {err})"

    print("KERNEL_OK")
</pallas_src>

<mosaic_0001>
module attributes {stable_mosaic.version = 11 : i64} {
  func.func @_znet_kernel(%arg0: i32, %arg1: memref<4x128xbf16, #tpu.memory_space<vmem>>, %arg2: memref<32x4xbf16, #tpu.memory_space<vmem>>, %arg3: memref<32x1xf32, #tpu.memory_space<vmem>>, %arg4: memref<32x32xbf16, #tpu.memory_space<vmem>>, %arg5: memref<32x1xf32, #tpu.memory_space<vmem>>, %arg6: memref<3x32xbf16, #tpu.memory_space<vmem>>, %arg7: memref<3x1xf32, #tpu.memory_space<vmem>>, %arg8: memref<3x128xf32, #tpu.memory_space<vmem>>) attributes {dimension_semantics = [#tpu.dimension_semantics<parallel>], iteration_bounds = array<i64: 2>, scalar_prefetch = 0 : i64, scratch_operands = 0 : i64, tpu.core_type = #tpu.core_type<tc>, window_params = [{transform_indices = @transform_0, window_bounds = array<i64: 4, 128>}, {pipeline_mode = #tpu.pipeline_mode<synchronous>, transform_indices = @transform_1, window_bounds = array<i64: 32, 4>}, {pipeline_mode = #tpu.pipeline_mode<synchronous>, transform_indices = @transform_2, window_bounds = array<i64: 32, 1>}, {pipeline_mode = #tpu.pipeline_mode<synchronous>, transform_indices = @transform_3, window_bounds = array<i64: 32, 32>}, {pipeline_mode = #tpu.pipeline_mode<synchronous>, transform_indices = @transform_4, window_bounds = array<i64: 32, 1>}, {pipeline_mode = #tpu.pipeline_mode<synchronous>, transform_indices = @transform_5, window_bounds = array<i64: 3, 32>}, {pipeline_mode = #tpu.pipeline_mode<synchronous>, transform_indices = @transform_6, window_bounds = array<i64: 3, 1>}, {transform_indices = @transform_7, window_bounds = array<i64: 3, 128>}]} {
    %c0 = arith.constant 0 : index
    %c0_0 = arith.constant 0 : index
    %0 = vector.load %arg2[%c0, %c0_0] : memref<32x4xbf16, #tpu.memory_space<vmem>>, vector<32x4xbf16>
    %c0_1 = arith.constant 0 : index
    %c0_2 = arith.constant 0 : index
    %1 = vector.load %arg3[%c0_1, %c0_2] : memref<32x1xf32, #tpu.memory_space<vmem>>, vector<32x1xf32>
    %c0_3 = arith.constant 0 : index
    %c0_4 = arith.constant 0 : index
    %2 = vector.load %arg4[%c0_3, %c0_4] : memref<32x32xbf16, #tpu.memory_space<vmem>>, vector<32x32xbf16>
    %c0_5 = arith.constant 0 : index
    %c0_6 = arith.constant 0 : index
    %3 = vector.load %arg5[%c0_5, %c0_6] : memref<32x1xf32, #tpu.memory_space<vmem>>, vector<32x1xf32>
    %c0_7 = arith.constant 0 : index
    %c0_8 = arith.constant 0 : index
    %4 = vector.load %arg6[%c0_7, %c0_8] : memref<3x32xbf16, #tpu.memory_space<vmem>>, vector<3x32xbf16>
    %c0_9 = arith.constant 0 : index
    %c0_10 = arith.constant 0 : index
    %5 = vector.load %arg7[%c0_9, %c0_10] : memref<3x1xf32, #tpu.memory_space<vmem>>, vector<3x1xf32>
    %c0_11 = arith.constant 0 : index
    %c0_12 = arith.constant 0 : index
    %6 = vector.load %arg1[%c0_11, %c0_12] : memref<4x128xbf16, #tpu.memory_space<vmem>>, vector<4x128xbf16>
    %cst = arith.constant dense<0.000000e+00> : vector<32x128xf32>
    %7 = tpu.matmul %0, %6, %cst {dimension_numbers = #tpu.dot_dimension_numbers<[1], [0], [0], [1], [0, 0, 1, 1], [], []>} : vector<32x4xbf16>, vector<4x128xbf16>, vector<32x128xf32> -> vector<32x128xf32>
    %8 = vector.broadcast %1 : vector<32x1xf32> to vector<32x128xf32>
    %9 = arith.addf %7, %8 : vector<32x128xf32>
    %10 = math.tanh %9 : vector<32x128xf32>
    %11 = arith.truncf %10 : vector<32x128xf32> to vector<32x128xbf16>
    %cst_13 = arith.constant dense<0.000000e+00> : vector<32x128xf32>
    %12 = tpu.matmul %2, %11, %cst_13 {dimension_numbers = #tpu.dot_dimension_numbers<[1], [0], [0], [1], [0, 0, 1, 1], [], []>} : vector<32x32xbf16>, vector<32x128xbf16>, vector<32x128xf32> -> vector<32x128xf32>
    %13 = vector.broadcast %3 : vector<32x1xf32> to vector<32x128xf32>
    %14 = arith.addf %12, %13 : vector<32x128xf32>
    %15 = math.tanh %14 : vector<32x128xf32>
    %16 = arith.truncf %15 : vector<32x128xf32> to vector<32x128xbf16>
    %cst_14 = arith.constant dense<0.000000e+00> : vector<3x128xf32>
    %17 = tpu.matmul %4, %16, %cst_14 {dimension_numbers = #tpu.dot_dimension_numbers<[1], [0], [0], [1], [0, 0, 1, 1], [], []>} : vector<3x32xbf16>, vector<32x128xbf16>, vector<3x128xf32> -> vector<3x128xf32>
    %18 = vector.broadcast %5 : vector<3x1xf32> to vector<3x128xf32>
    %19 = arith.addf %17, %18 : vector<3x128xf32>
    %c0_15 = arith.constant 0 : index
    %c0_16 = arith.constant 0 : index
    %20 = vector.load %arg8[%c0_15, %c0_16] : memref<3x128xf32, #tpu.memory_space<vmem>>, vector<3x128xf32>
    tpu.vector_store %arg8[%c0_15, %c0_16], %19 {strides = array<i32>} : memref<3x128xf32, #tpu.memory_space<vmem>>, vector<3x128xf32>,
    return
  }
  func.func @transform_0(%arg0: i32) -> (i32, i32) {
    %c0_i32 = arith.constant 0 : i32
    %c0_i32_0 = arith.constant 0 : i32
    return %c0_i32, %arg0 : i32, i32
  }
  func.func @transform_1(%arg0: i32) -> (i32, i32) {
    %c0_i32 = arith.constant 0 : i32
    %c0_i32_0 = arith.constant 0 : i32
    %c0_i32_1 = arith.constant 0 : i32
    return %c0_i32, %c0_i32_0 : i32, i32
  }
  func.func @transform_2(%arg0: i32) -> (i32, i32) {
    %c0_i32 = arith.constant 0 : i32
    %c0_i32_0 = arith.constant 0 : i32
    %c0_i32_1 = arith.constant 0 : i32
    return %c0_i32, %c0_i32_0 : i32, i32
  }
  func.func @transform_3(%arg0: i32) -> (i32, i32) {
    %c0_i32 = arith.constant 0 : i32
    %c0_i32_0 = arith.constant 0 : i32
    %c0_i32_1 = arith.constant 0 : i32
    return %c0_i32, %c0_i32_0 : i32, i32
  }
  func.func @transform_4(%arg0: i32) -> (i32, i32) {
    %c0_i32 = arith.constant 0 : i32
    %c0_i32_0 = arith.constant 0 : i32
    %c0_i32_1 = arith.constant 0 : i32
    return %c0_i32, %c0_i32_0 : i32, i32
  }
  func.func @transform_5(%arg0: i32) -> (i32, i32) {
    %c0_i32 = arith.constant 0 : i32
    %c0_i32_0 = arith.constant 0 : i32
    %c0_i32_1 = arith.constant 0 : i32
    return %c0_i32, %c0_i32_0 : i32, i32
  }
  func.func @transform_6(%arg0: i32) -> (i32, i32) {
    %c0_i32 = arith.constant 0 : i32
    %c0_i32_0 = arith.constant 0 : i32
    %c0_i32_1 = arith.constant 0 : i32
    return %c0_i32, %c0_i32_0 : i32, i32
  }
  func.func @transform_7(%arg0: i32) -> (i32, i32) {
    %c0_i32 = arith.constant 0 : i32
    %c0_i32_0 = arith.constant 0 : i32
    return %c0_i32, %arg0 : i32, i32
  }
}

</mosaic_0001>

<bundles_post_ra>
// kernel: tpu_custom_call.1
= control target key start
LH: loop header
LB: loop body
LE: loop exit
PB: predicated region body
PF: predicated region fallthrough
CT: control target
= control target key end

     0   :  { %12 = vsyncpa [#allocation3], 0  ;;  %s972_s0 = inlined_call_operand.vmem [shape: bf16[4,200], index: 0, kind: input, shape index: {}]   ;;  %s973_s1 = inlined_call_operand.vmem [shape: bf16[32,4], index: 1, kind: input, shape index: {}]   ;;  %s974_s2 = inlined_call_operand.vmem [shape: f32[32,1], index: 2, kind: input, shape index: {}]   ;;  %s975_s3 = inlined_call_operand.vmem [shape: bf16[32,32], index: 3, kind: input, shape index: {}]   ;;  %s976_s4 = inlined_call_operand.vmem [shape: f32[32,1], index: 4, kind: input, shape index: {}]   ;;  %s977_s5 = inlined_call_operand.vmem [shape: bf16[3,32], index: 5, kind: input, shape index: {}]   ;;  %s978_s6 = inlined_call_operand.vmem [shape: f32[3,1], index: 6, kind: input, shape index: {}]   ;;  %s979_s7 = inlined_call_operand.hbm [shape: f32[3,200], index: 7, kind: output, shape index: {}]  }
   0x1   :  { %14 = vsyncpa [#allocation3 + $0x1], 0  ;;  %s826_s24 = smov 0   ;;  %s828_s25 = smov 0  }
   0x2   :  { %s830_s26 = smov 0   ;;  %s832_s27 = smov 0  }
   0x3 LB: > { %s847_s28 = sadd.s32 4294967295, %s780_s27   ;;  %s604_s29 = sadd.s32 4294967294, %s780_s27   ;;  %s780_s27 = sphi %s832_s27, %s985_s27   ;;  %s776_s26 = sphi %s830_s26, %s984_s26   ;;  %s772_s25 = sphi %s828_s25, %s983_s25   ;;  %s768_s24 = sphi %s826_s24, %s982_s24  }
   0x4   : > { %s851_s30 = sadd.s32 1, %s780_s27   ;;  %s179_s8 = sadd.s32 1, %s776_s26 }
   0x5   : > { %s176_s9 = ssub.s32 %s780_s27, %s851_s30  ;;  %p189_p0 = scmp.ne.s32.totalorder %s776_s26, %s772_s25 }
   0x6   : > { %p177_p1 = scmp.eq.s32.totalorder %s176_s9, 0  ;;  %p190_p2 = scmp.eq.s32.totalorder %s847_s28, 1 }
   0x7   : > { %p195_p3 = scmp.ne.s32.totalorder %s772_s25, %s768_s24  ;;  %p196_p4 = scmp.eq.s32.totalorder %s604_s29, 1 }
   0x8   : > { %s862_s10 = scalar_select %p177_p1, %s776_s26, %s179_s8  }
   0x9   : > { %p864_p5 = por %p190_p2, %p189_p0  ;;  %p868_p6 = por %p196_p4, %p195_p3 }
   0xa   : > { %p607_p7 = scmp.ge.s32.totalorder %s780_s27, 1  ;;  %p239_p8 = scmp.lt.s32.totalorder %s780_s27, 3 }
   0xc   : > { %p240_p9 = pnand %p607_p7, %p239_p8 }
   0xd   : > { %p270_p10 = scmp.lt.s32.totalorder (!%p240_p9), %s847_s28, 1  ;;  %s267_s18 = sand.u32 (!%p240_p9), 1, %s772_s25  }
   0xe   : > { %243 = sbr.rel (%p240_p9) target bundleno = 682 (0x2aa), region = 48  ;;  %s608_s19 = sshll.u32 (!%p240_p9), %s267_s18, 2 }
   0xf   : > { %s269_s21 = scalar_lea.vmem (!%p240_p9), [#allocation2], %s608_s19  ;;  %s532_s9 = scalar_lea.sflag (!%p240_p9), [#allocation3], %s267_s18 }
  0x10   : > { %s545_s22 = sshll.u32 (!%p240_p9), %s269_s21, 4  ;;  %s785_s13 = smov (!%p240_p9), [#allocation2]   ;;  %s933_s22 = int_to_ptr.vmem [resolvable:$true] %s545_s22 }
  0x11   : > { %s724_s14 = sshll.u32 (!%p240_p9), %s785_s13, 4  ;;  %s725_s14 = int_to_ptr.vmem [resolvable:$false] %s724_s14 }
  0x12   : > { %p727_p0 = scmp.lt.s32.totalorder (!%p240_p9), %s933_s22, %s725_s14 }
  0x13   : > { %v700_v0 = vld [vmem:[%s973_s1] sm:$0xff]   ;;  %vm324_vm0 = vcmask 31744   ;;  %s271_s15 = scalar_select %p270_p10, %s847_s28, 1  ;;  %v281_v1 = vld [vmem:[%s974_s2 + $0x10] sm:$0xff]  ;;  %v782_v2 = vmov 0   ;;  %vm331_vm1 = vcmask 1041408  }
  0x14   : > { %635 = vmatprep.mubr.msk.bf16.mxu0 %vm324_vm0, %v700_v0  ;;  %698 = vset.pattern.permute.xlu0 %v782_v2  ;;  %v279_v3 = vld [vmem:[%s974_s2] sm:$0xff]  ;;  %v282_v4 = vld [vmem:[%s974_s2 + $0x18] sm:$0xff]  ;;  %v280_v5 = vld [vmem:[%s974_s2 + $0x8] sm:$0xff]  ;;  %vm420_vm2 = vcmask 261120   ;;  %v783_v34 = vmov 0.0   ;;  %vm784_vm3 = vmmov 0  }
  0x15   : > { %s609_s20 = sshll.u32 %s271_s15, 1  ;;  %306 = vperm.xlu0 %698, %v281_v1   ;;  %699 = vset.pattern.permute.xlu1 %v782_v2  ;;  %v701_v8 = vld [vmem:[%s973_s1 + $0x8] sm:$0xff]   ;;  %v289_v9 = vld [vmem:[%s976_s4 + $0x10] sm:$0xff]  ;;  %v290_v10 = vld [vmem:[%s976_s4 + $0x18] sm:$0xff]  ;;  %s726_s15 = scalar_lea.vmem %s725_s14, 128 }
  0x16   : > { %s273_s8 = scalar_lea.vmem %s972_s0, %s609_s20  ;;  %296 = vperm.xlu1 %699, %v279_v3   ;;  %v287_v11 = vld [vmem:[%s976_s4] sm:$0xff]  ;;  %v288_v12 = vld [vmem:[%s976_s4 + $0x8] sm:$0xff]  ;;  %s620_s20 = sshll.u32 %s847_s28, 6 }
  0x17   : > { %v293_v6 = vld [vmem:[%s273_s8] sm:$0x3]  ;;  %v703_v33 = vld [vmem:[%s975_s3 + $0x8] sm:$0xff]   ;;  %s931_s8 = scalar_lea.hbm %s979_s7, %s620_s20  ;;  %s720_s28 = scalar_lea.vmem %s933_s22, 64 }
  0x18   : > { %655 = vmatprep.subr.msk.bf16.mxu0 %vm331_vm1, %v293_v6  ;;  %v333_v7 = vsel %vm331_vm1, %v293_v6, 0  ;;  %v292_v13 = vld [vmem:[%s978_s6] sm:$0x7]  ;;  %p721_p11 = scmp.ne.s32.totalorder %s933_s22, %s720_s28  ;;  %p728_p1 = scmp.lt.s32.totalorder %s726_s15, %s720_s28 }
  0x19   : > { %634 = vmatpush3.bf16.msra.mxu0 %v333_v7  ;;  %311 = vperm.xlu0 %698, %v282_v4   ;;  %v702_v14 = vld [vmem:[%s975_s3] sm:$0xff]  }
  0x1a   : > { %301 = vperm.xlu1 %699, %v280_v5   ;;  %643 = vmatprep.mubr.msk.bf16.mxu1 %vm420_vm2, %v702_v14  ;;  %v291_v53 = vld [vmem:[%s977_s5] sm:$0x3]  ;;  %p722_p12 = pnand %p721_p11, %p864_p5  ;;  %p729_p2 = por %p728_p1, %p727_p0 }
  0x1b   : > { %647 = vmatprep.subr.bf16.mxu0 %v783_v34 }
  0x1c   : > { %636 = vmatmul.mubr.msk.bf16.vlgmr.msra.gmra.mxu0 %vm324_vm0, %v701_v8  ;;  %p723_p13 = pneg %p722_p12 }
  0x1d   : > { %402 = vperm.xlu0 %698, %v289_v9   ;;  %651 = vmatprep.mubr.msk.bf16.mxu0 %vm784_vm3, %v783_v34 }
  0x1e   : > { %407 = vperm.xlu1 %699, %v290_v10   ;;  %p730_p3 = pnand %p729_p2, %p723_p13 }
  0x21   : > { %392 = vperm.xlu0 %698, %v287_v11  }
  0x22   : > { %397 = vperm.xlu1 %699, %v288_v12  }
  0x25   : > { %484 = vperm.xlu0 %698, %v292_v13  }
  0x90   : > { %v307_v15 = vpop.permute.xlu0 %306 }
  0x91   : > { %v297_v16 = vpop.permute.xlu1 %296 }
  0x94   : > { %v312_v20 = vpop.permute.xlu0 %311 }
  0x95   : > { %v302_v24 = vpop.permute.xlu1 %301 }
  0x98   : > { %v403_v35 = vpop.permute.xlu0 %402 }
  0x99   : > { %v408_v36 = vpop.permute.xlu1 %407 }
  0x9c   : > { %v393_v41 = vpop.permute.xlu0 %392 }
  0x9d   : > { %v398_v43 = vpop.permute.xlu1 %397 }
  0xa0   : > { %v485_v54 = vpop.permute.xlu0 %484 }
  0xdc   : > { %v637_v17 = vpop.f32.mrf.mxu0 }
  0xdd   : > { %v378_v18 = vadd.f32 %v637_v17, %v307_v15 }
  0xde   : > { %v369_v19 = vpop.f32.mrf.mxu0 }
  0xdf   : > { %v370_v21 = vadd.f32 %v369_v19, %v297_v16  ;;  %704 = vtanh.f32 %v378_v18 }
  0xe0   : > { %v638_v22 = vpop.f32.mrf.mxu0 }
  0xe1   : > { %v381_v23 = vadd.f32 %v638_v22, %v312_v20 }
  0xe2   : > { %v372_v25 = vpop.f32.mrf.mxu0 }
  0xe3   : > { %706 = vtanh.f32 %v381_v23  ;;  %v373_v26 = vadd.f32 %v372_v25, %v302_v24 }
  0xe4   : > { %708 = vtanh.f32 %v370_v21 }
  0xe5   : > { %710 = vtanh.f32 %v373_v26 }
  0xec   : > { %v705_v27 = vpop.eup %704 }
  0xf0   : > { %v707_v28 = vpop.eup %706 }
  0xf1   : > { %v709_v29 = vpop.eup %708  ;;  %v389_v30 = vpack.c.bf16 %v707_v28, %v705_v27 }
  0xf2   : > { %v711_v31 = vpop.eup %710 }
  0xf3   : > { %639 = vmatprep.subr.bf16.mxu1 %v389_v30  ;;  %v388_v32 = vpack.c.bf16 %v711_v31, %v709_v29 }
  0xf4   : > { %640 = vmatpush3.bf16.msra.mxu1 %v389_v30 }
  0xf5   : > { %641 = vmatprep.subr.bf16.mxu1 %v388_v32 }
  0xf8   : > { %642 = vmatpush3.bf16.msra.mxu1 %v388_v32 }
  0xfb   : > { %644 = vmatmul.mubr.msk.bf16.vlgmr.msra.gmra.mxu1 %vm420_vm2, %v703_v33 }
 0x1bb   : > { %v645_v37 = vpop.f32.mrf.mxu1 }
 0x1bc   : > { %v470_v38 = vadd.f32 %v645_v37, %v403_v35 }
 0x1bd   : > { %v461_v39 = vpop.f32.mrf.mxu1 }
 0x1be   : > { %712 = vtanh.f32 %v470_v38  ;;  %v462_v45 = vadd.f32 %v461_v39, %v393_v41 }
 0x1bf   : > { %v646_v40 = vpop.f32.mrf.mxu1 }
 0x1c0   : > { %v473_v42 = vadd.f32 %v646_v40, %v408_v36 }
 0x1c1   : > { %v464_v44 = vpop.f32.mrf.mxu1 }
 0x1c2   : > { %714 = vtanh.f32 %v473_v42  ;;  %v465_v46 = vadd.f32 %v464_v44, %v398_v43 }
 0x1c4   : > { %716 = vtanh.f32 %v465_v46 }
 0x1c5   : > { %718 = vtanh.f32 %v462_v45 }
 0x1cb   : > { %v713_v47 = vpop.eup %712 }
 0x1cf   : > { %v715_v48 = vpop.eup %714 }
 0x1d0   : > { %v481_v49 = vpack.c.bf16 %v715_v48, %v713_v47 }
 0x1d1   : > { %v717_v50 = vpop.eup %716 }
 0x1d2   : > { %648 = vmatpush3.bf16.msra.mxu0 %v481_v49  ;;  %v719_v51 = vpop.eup %718 }
 0x1d3   : > { %649 = vmatprep.subr.bf16.mxu0 %v783_v34  ;;  %v480_v52 = vpack.c.bf16 %v717_v50, %v719_v51 }
 0x1d6   : > { %650 = vmatpush3.bf16.msra.mxu0 %v480_v52 }
 0x1d9   : > { %652 = vmatmul.mubr.msk.bf16.vlgmr.msra.gmra.mxu0 %vm420_vm2, %v291_v53 }
 0x299   : > { %v524_v55 = vpop.f32.mrf.mxu0 }
 0x29a   : > { %v525_v56 = vadd.f32 %v524_v55, %v485_v54 }
 0x29b   : > { %v653_v57 = vpop.f32.mrf.mxu0 }
 0x29c   : > { %530 = vst [vmem:[%s269_s21] sm:$0x7] %v525_v56 }
 0x29d   : > { %v527_v58 = vpop.f32.mrf.mxu0 }
 0x29e   : > { %733 = shalt.err (!%p730_p3)
}
 0x29f   : > { %s734_s16 = scalar_lea.hbm %s931_s8, 64  ;;  %s738_s19 = scalar_lea.hbm %s979_s7, 128 }
 0x2a0   : > { %p735_p4 = scmp.ne.s32.totalorder %s931_s8, %s734_s16  ;;  %p739_p9 = scmp.lt.s32.totalorder %s931_s8, %s979_s7 }
 0x2a1   : > { %p740_p10 = scmp.lt.s32.totalorder %s738_s19, %s734_s16 }
 0x2a2   : > { %p736_p7 = pnand %p735_p4, %p864_p5 }
 0x2a3   : > { %p741_p11 = por %p740_p10, %p739_p9 }
 0x2a4   : > { %p737_p8 = pneg %p736_p7 }
 0x2a6   : > { %p742_p12 = pnand %p741_p11, %p737_p8 }
 0x2a8   : > { %745 = shalt.err (!%p742_p12)
}
 0x2a9   : > { %656 = dma.vmem_to_hbm [thread:$0]  (%p864_p5), %s933_s22, 64, %s931_s8, %s532_s9   ;;  %v654_v59 = vpop.f32.mrf.mxu0 }
 0x2aa PF: > { %p662_p13 = scmp.ge.s32.totalorder %s780_s27, 2  ;;  %s557_s23 = sand.u32 1, %s768_s24  }
 0x2ab   : > { %s558_s29 = scalar_lea.sflag [#allocation3], %s557_s23 }
 0x2ac   : > { %p659_p0 = pnand %p662_p13, %p868_p6 }
 0x2ae   : > { %p660_p1 = pneg %p659_p0 }
 0x2b0   : > { %763 = dma.done.wait (%p660_p1), %s558_s29, 64  }
 0x2b1   : > { %765 = vsyncadd (%p660_p1), %s558_s29, 4294967232  ;;  %p17_p2 = scmp.ge.s32.totalorder %s851_s30, 4   ;;  %s982_s24 = smov %s772_s25 }
 0x2b2   : > { %s983_s25 = smov %s776_s26  ;;  %s984_s26 = smov %s862_s10 }
 0x2b3   : > { %s985_s27 = smov %s851_s30  ;;  %19 = sbr.rel (!%p17_p2) target bundleno = 3 (0x3), region = 83 }
 0x2b8   :  { %563 = vsyncpa [#allocation3], 1 }
 0x2b9   :  { %565 = vsyncpa [#allocation3 + $0x1], 1 }

</bundles_post_ra>
